<compile_context>
chip_gen: v6e
topology: v6e:2x2x1
jax: 0.10.0
libtpu: 0.0.40
codegen_flags: <defaults>
</compile_context>

<pallas_src>
import functools

import jax
import jax.numpy as jnp
from jax.experimental import pallas as pl
from jax.experimental.pallas import tpu as pltpu


def _label_smoothing_kernel(pred_ref, labels_ref, cw_ref, out_ref,
                            acc_loss_ref, acc_w_ref, *,
                            classes, smoothing, confidence, gamma,
                            batch, tile, inner_steps):
    ci = pl.program_id(0)          # shard (parallel) axis
    j = pl.program_id(1)           # batch-tile (reduction) axis

    @pl.when(j == 0)
    def _():
        acc_loss_ref[...] = jnp.zeros_like(acc_loss_ref)
        acc_w_ref[...] = jnp.zeros_like(acc_w_ref)

    pred = pred_ref[...].astype(jnp.float32)      # (TB, C)
    labels = labels_ref[...]                      # (TB, 1) int32
    cw = cw_ref[...].astype(jnp.float32)          # (1, C)

    tb, c = pred.shape
    col = jax.lax.broadcasted_iota(jnp.int32, (tb, c), dimension=1)
    onehot = col == labels                        # (TB, C) bool

    # numerically-stable log-softmax pieces; log_probs never materialized
    m = jnp.max(pred, axis=-1, keepdims=True)
    z = pred - m
    log_se = jnp.log(jnp.sum(jnp.exp(z), axis=-1, keepdims=True))   # (TB, 1)
    sum_z = jnp.sum(z, axis=-1, keepdims=True)                       # (TB, 1)
    z_t = jnp.sum(jnp.where(onehot, z, 0.0), axis=-1, keepdims=True)  # (TB, 1)

    sum_logp = sum_z - c * log_se
    logp_t = z_t - log_se

    smooth_val = smoothing / (classes - 1)
    # sum(true_dist * log_probs) = smooth*sum_logp + (conf - smooth)*logp_target
    row_loss = -(smooth_val * sum_logp + (confidence - smooth_val) * logp_t)

    if gamma > 0.0:
        pt = jnp.exp(logp_t)
        one_minus_pt = 1.0 - pt
        if float(gamma).is_integer() and 1 <= int(gamma) <= 4:
            fw = one_minus_pt
            for _ in range(int(gamma) - 1):        # e.g. gamma=2 -> one extra mul
                fw = fw * one_minus_pt
        else:
            fw = jnp.power(one_minus_pt, gamma)
        row_loss = row_loss * fw

    # per-sample weight = class_weights[label] via the one-hot mask
    sample_w = jnp.sum(jnp.where(onehot, cw, 0.0), axis=-1, keepdims=True)  # (TB,1)

    # mask ragged-tail / overhanging rows on the PRODUCT so NaN from garbage
    # rows cannot propagate (NaN * 0 would be NaN).
    row_iota = jax.lax.broadcasted_iota(jnp.int32, (tb, 1), dimension=0)
    global_row = (ci * inner_steps + j) * tile + row_iota
    in_bounds = global_row < batch

    acc_loss_ref[...] += jnp.where(in_bounds, row_loss * sample_w, 0.0)
    acc_w_ref[...] += jnp.where(in_bounds, sample_w, 0.0)

    @pl.when(j == pl.num_programs(1) - 1)
    def _():
        tot_loss = jnp.sum(acc_loss_ref[...])
        tot_w = jnp.sum(acc_w_ref[...])
        r = jax.lax.broadcasted_iota(jnp.int32, (8, 128), 0)
        l = jax.lax.broadcasted_iota(jnp.int32, (8, 128), 1)
        out_ref[...] = jnp.where((r == 0) & (l == 0), tot_loss,
                                 jnp.where((r == 0) & (l == 1), tot_w, 0.0))


def _round_up(x, m):
    return ((x + m - 1) // m) * m


def _vmem_capacity_bytes():
    try:
        return int(pltpu.get_tpu_info().vmem_capacity_bytes)
    except Exception:
        return 64 * 1024 * 1024      # conservative (v7x-sized) fallback


def _num_tensorcores():
    """Best-effort: 2 on megacore chips (v4/v5p/v7x), else 1."""
    try:
        kind = jax.devices()[0].device_kind.lower()
    except Exception:
        return 1
    for tag in ("v5 lite", "v5litepod", "v5e", "v6 lite", "v6e", "v2", "v3"):
        if tag in kind:
            return 1
    for tag in ("v4", "v5p", "v7", "7x"):
        if tag in kind:
            return 2
    return 1


def _choose_batch_tile(batch, classes, itemsize, vmem_bytes):
    """Largest multiple-of-8 row tile that fits the VMEM budget (sized by bytes)."""
    lanes = _round_up(classes, 128)                # lane-padded footprint per row
    # pred double-buffer (input dtype) + ~5 lane-padded f32 (TB, C) temporaries
    # + labels double-buffer + 2 accumulators (all single-column, lane-padded).
    per_row = lanes * (2 * itemsize + 5 * 4) + 4 * 128 * 4
    budget = max(2 * 1024 * 1024, vmem_bytes // 4)  # ~16 MiB on v7x, ~32 MiB on v5e/v6e
    rows = budget // per_row
    rows = min(rows, 32768)
    rows = min(rows, _round_up(batch, 8))
    rows = max(8, (rows // 8) * 8)
    return int(rows)


def label_smoothing_loss(pred, target, class_weights=None, *,
                         classes, smoothing=0.1, reduction='mean', gamma=0.0,
                         batch_tile=None):
    """Pallas TPU implementation of LabelSmoothingLoss.forward."""
    if reduction not in ('mean', 'sum'):
        raise ValueError("Reduction must be 'mean' or 'sum'")
    if classes < 2:
        raise ValueError("classes must be >= 2 (smoothing / (classes - 1))")
    b, c = pred.shape
    assert c == classes
    assert target.shape == (b, c)

    if class_weights is None:
        class_weights = jnp.ones((classes,), dtype=pred.dtype)
    cw2d = class_weights.reshape(1, classes)

    # Collapse the dense target to int32 labels once in XLA (argmax, first
    # occurrence, matching torch/jnp); the kernel then only streams `pred`.
    labels = jnp.argmax(target, axis=-1).astype(jnp.int32).reshape(b, 1)

    itemsize = jnp.dtype(pred.dtype).itemsize
    vmem_cap = _vmem_capacity_bytes()
    if batch_tile is None:
        batch_tile = _choose_batch_tile(b, classes, itemsize, vmem_cap)
    batch_tile = max(8, _round_up(int(batch_tile), 8))

    num_tiles = -(-b // batch_tile)
    num_shards = 2 if (_num_tensorcores() >= 2 and num_tiles >= 2) else 1
    inner_steps = -(-num_tiles // num_shards)

    def tile_index(ci, j):
        # Clamp: an overhanging shard step re-reads the last tile; the in-kernel
        # row mask (computed from the *unclamped* index) zeroes its contribution.
        return jnp.minimum(ci * inner_steps + j, num_tiles - 1)

    kernel = functools.partial(
        _label_smoothing_kernel,
        classes=classes,
        smoothing=float(smoothing),
        confidence=1.0 - float(smoothing),
        gamma=float(gamma),
        batch=b,
        tile=batch_tile,
        inner_steps=inner_steps,
    )

    out = pl.pallas_call(
        kernel,
        out_shape=jax.ShapeDtypeStruct((num_shards * 8, 128), jnp.float32),
        grid_spec=pltpu.PrefetchScalarGridSpec(
            num_scalar_prefetch=0,
            grid=(num_shards, inner_steps),
            in_specs=[
                pl.BlockSpec((batch_tile, classes),
                             lambda ci, j: (tile_index(ci, j), 0)),
                pl.BlockSpec((batch_tile, 1),
                             lambda ci, j: (tile_index(ci, j), 0)),
                pl.BlockSpec((1, classes), lambda ci, j: (0, 0)),
            ],
            out_specs=pl.BlockSpec((8, 128), lambda ci, j: (ci, 0)),
            scratch_shapes=[
                pltpu.VMEM((batch_tile, 1), jnp.float32),  # weighted-loss per row
                pltpu.VMEM((batch_tile, 1), jnp.float32),  # sample weight per row
            ],
        ),
        compiler_params=pltpu.CompilerParams(
            dimension_semantics=("parallel", "arbitrary"),
            vmem_limit_bytes=min(int(vmem_cap * 3 // 4), 112 * 1024 * 1024),
        ),
    )(pred, labels, cw2d)

    partials = out.reshape(num_shards, 8, 128)
    total_loss = jnp.sum(partials[:, 0, 0])
    total_w = jnp.sum(partials[:, 0, 1])
    if reduction == 'sum':
        return total_loss
    return total_loss / total_w


def _reference(pred, target, class_weights, *, classes, smoothing, reduction, gamma):
    """Pure-JAX reference mirroring the PyTorch forward."""
    confidence = 1.0 - smoothing
    pred = pred.astype(jnp.float32)
    probs = jax.nn.softmax(pred, axis=-1)
    log_probs = jax.nn.log_softmax(pred, axis=-1)
    target_idx = jnp.argmax(target, axis=-1)
    if class_weights is None:
        class_weights = jnp.ones((classes,), dtype=pred.dtype)
    true_dist = jnp.full_like(pred, smoothing / (classes - 1))
    true_dist = true_dist.at[jnp.arange(pred.shape[0]), target_idx].set(confidence)
    sample_weights = class_weights[target_idx].astype(jnp.float32)
    loss = -true_dist * log_probs
    if gamma > 0:
        pt = probs[jnp.arange(pred.shape[0]), target_idx][:, None]
        loss = loss * (1.0 - pt) ** gamma
    loss = jnp.sum(loss, axis=-1) * sample_weights
    if reduction == 'sum':
        return jnp.sum(loss)
    return jnp.sum(loss) / jnp.sum(sample_weights)


if __name__ == "__main__":
    key = jax.random.PRNGKey(0)
    k1, k2, k3, k4, k5 = jax.random.split(key, 5)

    # ---- config 1: mean reduction, focal gamma=2, class weights ----
    B, C = 16, 10
    smoothing = 0.1
    gamma = 2.0

    pred = jax.random.normal(k1, (B, C), dtype=jnp.float32)
    labels = jax.random.randint(k2, (B,), 0, C)
    target = jax.nn.one_hot(labels, C, dtype=jnp.float32)
    class_weights = jax.random.uniform(k3, (C,), dtype=jnp.float32,
                                       minval=0.5, maxval=2.0)

    loss = label_smoothing_loss(
        pred, target, class_weights,
        classes=C, smoothing=smoothing, reduction='mean', gamma=gamma)
    loss = jax.block_until_ready(loss)
    ref = _reference(pred, target, class_weights,
                     classes=C, smoothing=smoothing, reduction='mean', gamma=gamma)
    assert jnp.allclose(loss, ref, rtol=1e-4, atol=1e-5), (loss, ref)

    # ---- config 2: non-multiple-of-8 batch (ragged tail mask), sum reduction ----
    B2 = 13
    pred2 = jax.random.normal(k4, (B2, C), dtype=jnp.float32)
    labels2 = jax.random.randint(k5, (B2,), 0, C)
    target2 = jax.nn.one_hot(labels2, C, dtype=jnp.float32)

    loss2 = label_smoothing_loss(
        pred2, target2, None,
        classes=C, smoothing=smoothing, reduction='sum', gamma=0.0)
    loss2 = jax.block_until_ready(loss2)
    ref2 = _reference(pred2, target2, None,
                      classes=C, smoothing=smoothing, reduction='sum', gamma=0.0)
    assert jnp.allclose(loss2, ref2, rtol=1e-4, atol=1e-5), (loss2, ref2)

    print("KERNEL_OK")
</pallas_src>

<mosaic_0001>
module attributes {stable_mosaic.version = 11 : i64} {
  func.func @_label_smoothing_kernel(%arg0: i32, %arg1: i32, %arg2: memref<16x10xf32, #tpu.memory_space<vmem>>, %arg3: memref<16x1xi32, #tpu.memory_space<vmem>>, %arg4: memref<1x10xf32, #tpu.memory_space<vmem>>, %arg5: memref<8x128xf32, #tpu.memory_space<vmem>>, %arg6: memref<16x1xf32, #tpu.memory_space<vmem>>, %arg7: memref<16x1xf32, #tpu.memory_space<vmem>>) attributes {dimension_semantics = [#tpu.dimension_semantics<parallel>, #tpu.dimension_semantics<arbitrary>], iteration_bounds = array<i64: 1, 1>, scalar_prefetch = 0 : i64, scratch_operands = 2 : i64, tpu.core_type = #tpu.core_type<tc>, window_params = [{transform_indices = @transform_0, window_bounds = array<i64: 16, 10>}, {transform_indices = @transform_1, window_bounds = array<i64: 16, 1>}, {pipeline_mode = #tpu.pipeline_mode<synchronous>, transform_indices = @transform_2, window_bounds = array<i64: 1, 10>}, {transform_indices = @transform_3, window_bounds = array<i64: 8, 128>}]} {
    %c0_i32 = arith.constant 0 : i32
    %0 = arith.cmpi eq, %arg1, %c0_i32 : i32
    %1 = arith.extui %0 : i1 to i32
    %c0_i32_0 = arith.constant 0 : i32
    %2 = arith.cmpi ne, %1, %c0_i32_0 : i32
    scf.if %2 {
      %cst_30 = arith.constant 0.000000e+00 : f32
      %67 = vector.broadcast %cst_30 : f32 to vector<16x1xf32>
      %c0_31 = arith.constant 0 : index
      %c0_32 = arith.constant 0 : index
      %68 = vector.load %arg6[%c0_31, %c0_32] : memref<16x1xf32, #tpu.memory_space<vmem>>, vector<16x1xf32>
      tpu.vector_store %arg6[%c0_31, %c0_32], %67 {strides = array<i32>} : memref<16x1xf32, #tpu.memory_space<vmem>>, vector<16x1xf32>,
      %cst_33 = arith.constant 0.000000e+00 : f32
      %69 = vector.broadcast %cst_33 : f32 to vector<16x1xf32>
      %c0_34 = arith.constant 0 : index
      %c0_35 = arith.constant 0 : index
      %70 = vector.load %arg7[%c0_34, %c0_35] : memref<16x1xf32, #tpu.memory_space<vmem>>, vector<16x1xf32>
      tpu.vector_store %arg7[%c0_34, %c0_35], %69 {strides = array<i32>} : memref<16x1xf32, #tpu.memory_space<vmem>>, vector<16x1xf32>,
    } else {
    }
    %c0 = arith.constant 0 : index
    %c0_1 = arith.constant 0 : index
    %3 = vector.load %arg2[%c0, %c0_1] : memref<16x10xf32, #tpu.memory_space<vmem>>, vector<16x10xf32>
    %c0_2 = arith.constant 0 : index
    %c0_3 = arith.constant 0 : index
    %4 = vector.load %arg3[%c0_2, %c0_3] : memref<16x1xi32, #tpu.memory_space<vmem>>, vector<16x1xi32>
    %c0_4 = arith.constant 0 : index
    %c0_5 = arith.constant 0 : index
    %5 = vector.load %arg4[%c0_4, %c0_5] : memref<1x10xf32, #tpu.memory_space<vmem>>, vector<1x10xf32>
    %6 = tpu.iota {dimensions = array<i32: 1>} : vector<16x10xi32>
    %7 = vector.broadcast %4 : vector<16x1xi32> to vector<16x10xi32>
    %8 = arith.cmpi eq, %6, %7 : vector<16x10xi32>
    %cst = arith.constant dense<0xFF800000> : vector<16xf32>
    %9 = vector.multi_reduction <maximumf>, %3, %cst [1] : vector<16x10xf32> to vector<16xf32>
    %10 = vector.shape_cast %9 : vector<16xf32> to vector<16x1xf32>
    %11 = vector.broadcast %10 : vector<16x1xf32> to vector<16x10xf32>
    %12 = arith.subf %3, %11 : vector<16x10xf32>
    %13 = math.exp %12 : vector<16x10xf32>
    %cst_6 = arith.constant dense<0.000000e+00> : vector<16xf32>
    %14 = vector.multi_reduction <add>, %13, %cst_6 [1] : vector<16x10xf32> to vector<16xf32>
    %15 = vector.shape_cast %14 : vector<16xf32> to vector<16x1xf32>
    %16 = math.log %15 : vector<16x1xf32>
    %cst_7 = arith.constant dense<0.000000e+00> : vector<16xf32>
    %17 = vector.multi_reduction <add>, %12, %cst_7 [1] : vector<16x10xf32> to vector<16xf32>
    %18 = vector.shape_cast %17 : vector<16xf32> to vector<16x1xf32>
    %cst_8 = arith.constant 0.000000e+00 : f32
    %19 = vector.broadcast %cst_8 : f32 to vector<16x10xf32>
    %20 = arith.select %8, %12, %19 : vector<16x10xi1>, vector<16x10xf32>
    %cst_9 = arith.constant dense<0.000000e+00> : vector<16xf32>
    %21 = vector.multi_reduction <add>, %20, %cst_9 [1] : vector<16x10xf32> to vector<16xf32>
    %22 = vector.shape_cast %21 : vector<16xf32> to vector<16x1xf32>
    %cst_10 = arith.constant 1.000000e+01 : f32
    %23 = vector.broadcast %cst_10 : f32 to vector<16x1xf32>
    %24 = arith.mulf %23, %16 : vector<16x1xf32>
    %25 = arith.subf %18, %24 : vector<16x1xf32>
    %26 = arith.subf %22, %16 : vector<16x1xf32>
    %cst_11 = arith.constant 0.0111111114 : f32
    %27 = vector.broadcast %cst_11 : f32 to vector<16x1xf32>
    %28 = arith.mulf %27, %25 : vector<16x1xf32>
    %cst_12 = arith.constant 0.888888895 : f32
    %29 = vector.broadcast %cst_12 : f32 to vector<16x1xf32>
    %30 = arith.mulf %29, %26 : vector<16x1xf32>
    %31 = arith.addf %28, %30 : vector<16x1xf32>
    %cst_13 = arith.constant 0.000000e+00 : f32
    %32 = vector.broadcast %cst_13 : f32 to vector<16x1xf32>
    %33 = arith.subf %32, %31 : vector<16x1xf32>
    %34 = math.exp %26 : vector<16x1xf32>
    %cst_14 = arith.constant 1.000000e+00 : f32
    %35 = vector.broadcast %cst_14 : f32 to vector<16x1xf32>
    %36 = arith.subf %35, %34 : vector<16x1xf32>
    %37 = arith.mulf %36, %36 : vector<16x1xf32>
    %38 = arith.mulf %33, %37 : vector<16x1xf32>
    %cst_15 = arith.constant 0.000000e+00 : f32
    %39 = vector.shape_cast %5 : vector<1x10xf32> to vector<1x10xf32>
    %40 = vector.broadcast %39 : vector<1x10xf32> to vector<16x10xf32>
    %41 = vector.broadcast %cst_15 : f32 to vector<16x10xf32>
    %42 = arith.select %8, %40, %41 : vector<16x10xi1>, vector<16x10xf32>
    %cst_16 = arith.constant dense<0.000000e+00> : vector<16xf32>
    %43 = vector.multi_reduction <add>, %42, %cst_16 [1] : vector<16x10xf32> to vector<16xf32>
    %44 = vector.shape_cast %43 : vector<16xf32> to vector<16x1xf32>
    %45 = tpu.iota {dimensions = array<i32: 0>} : vector<16x1xi32>
    %c1_i32 = arith.constant 1 : i32
    %46 = arith.muli %arg0, %c1_i32 : i32
    %47 = arith.addi %46, %arg1 : i32
    %c16_i32 = arith.constant 16 : i32
    %48 = arith.muli %47, %c16_i32 : i32
    %49 = vector.broadcast %48 : i32 to vector<16x1xi32>
    %50 = arith.addi %49, %45 : vector<16x1xi32>
    %c16_i32_17 = arith.constant 16 : i32
    %51 = vector.broadcast %c16_i32_17 : i32 to vector<16x1xi32>
    %52 = arith.cmpi slt, %50, %51 : vector<16x1xi32>
    %c0_18 = arith.constant 0 : index
    %c0_19 = arith.constant 0 : index
    %53 = vector.load %arg6[%c0_18, %c0_19] : memref<16x1xf32, #tpu.memory_space<vmem>>, vector<16x1xf32>
    %54 = arith.mulf %38, %44 : vector<16x1xf32>
    %cst_20 = arith.constant 0.000000e+00 : f32
    %55 = vector.broadcast %cst_20 : f32 to vector<16x1xf32>
    %56 = arith.select %52, %54, %55 : vector<16x1xi1>, vector<16x1xf32>
    %57 = arith.addf %53, %56 : vector<16x1xf32>
    %c0_21 = arith.constant 0 : index
    %c0_22 = arith.constant 0 : index
    %58 = vector.load %arg6[%c0_21, %c0_22] : memref<16x1xf32, #tpu.memory_space<vmem>>, vector<16x1xf32>
    tpu.vector_store %arg6[%c0_21, %c0_22], %57 {strides = array<i32>} : memref<16x1xf32, #tpu.memory_space<vmem>>, vector<16x1xf32>,
    %c0_23 = arith.constant 0 : index
    %c0_24 = arith.constant 0 : index
    %59 = vector.load %arg7[%c0_23, %c0_24] : memref<16x1xf32, #tpu.memory_space<vmem>>, vector<16x1xf32>
    %cst_25 = arith.constant 0.000000e+00 : f32
    %60 = vector.broadcast %cst_25 : f32 to vector<16x1xf32>
    %61 = arith.select %52, %44, %60 : vector<16x1xi1>, vector<16x1xf32>
    %62 = arith.addf %59, %61 : vector<16x1xf32>
    %c0_26 = arith.constant 0 : index
    %c0_27 = arith.constant 0 : index
    %63 = vector.load %arg7[%c0_26, %c0_27] : memref<16x1xf32, #tpu.memory_space<vmem>>, vector<16x1xf32>
    tpu.vector_store %arg7[%c0_26, %c0_27], %62 {strides = array<i32>} : memref<16x1xf32, #tpu.memory_space<vmem>>, vector<16x1xf32>,
    %c0_i32_28 = arith.constant 0 : i32
    %64 = arith.cmpi eq, %arg1, %c0_i32_28 : i32
    %65 = arith.extui %64 : i1 to i32
    %c0_i32_29 = arith.constant 0 : i32
    %66 = arith.cmpi ne, %65, %c0_i32_29 : i32
    scf.if %66 {
      %c0_30 = arith.constant 0 : index
      %c0_31 = arith.constant 0 : index
      %67 = vector.load %arg6[%c0_30, %c0_31] : memref<16x1xf32, #tpu.memory_space<vmem>>, vector<16x1xf32>
      %68 = vector.shape_cast %67 : vector<16x1xf32> to vector<1x16x1xf32>
      %cst_32 = arith.constant dense<0.000000e+00> : vector<1xf32>
      %69 = vector.multi_reduction <add>, %68, %cst_32 [1, 2] : vector<1x16x1xf32> to vector<1xf32>
      %70 = vector.shape_cast %69 : vector<1xf32> to vector<1x1x1xf32>
      %71 = vector.extract %70[0, 0, 0] : f32 from vector<1x1x1xf32>
      %c0_33 = arith.constant 0 : index
      %c0_34 = arith.constant 0 : index
      %72 = vector.load %arg7[%c0_33, %c0_34] : memref<16x1xf32, #tpu.memory_space<vmem>>, vector<16x1xf32>
      %73 = vector.shape_cast %72 : vector<16x1xf32> to vector<1x16x1xf32>
      %cst_35 = arith.constant dense<0.000000e+00> : vector<1xf32>
      %74 = vector.multi_reduction <add>, %73, %cst_35 [1, 2] : vector<1x16x1xf32> to vector<1xf32>
      %75 = vector.shape_cast %74 : vector<1xf32> to vector<1x1x1xf32>
      %76 = vector.extract %75[0, 0, 0] : f32 from vector<1x1x1xf32>
      %77 = tpu.iota {dimensions = array<i32: 0>} : vector<8x128xi32>
      %78 = tpu.iota {dimensions = array<i32: 1>} : vector<8x128xi32>
      %c0_i32_36 = arith.constant 0 : i32
      %79 = vector.broadcast %c0_i32_36 : i32 to vector<8x128xi32>
      %80 = arith.cmpi eq, %77, %79 : vector<8x128xi32>
      %c0_i32_37 = arith.constant 0 : i32
      %81 = vector.broadcast %c0_i32_37 : i32 to vector<8x128xi32>
      %82 = arith.cmpi eq, %78, %81 : vector<8x128xi32>
      %83 = arith.andi %80, %82 : vector<8x128xi1>
      %c0_i32_38 = arith.constant 0 : i32
      %84 = vector.broadcast %c0_i32_38 : i32 to vector<8x128xi32>
      %85 = arith.cmpi eq, %77, %84 : vector<8x128xi32>
      %c1_i32_39 = arith.constant 1 : i32
      %86 = vector.broadcast %c1_i32_39 : i32 to vector<8x128xi32>
      %87 = arith.cmpi eq, %78, %86 : vector<8x128xi32>
      %88 = arith.andi %85, %87 : vector<8x128xi1>
      %cst_40 = arith.constant 0.000000e+00 : f32
      %89 = vector.broadcast %76 : f32 to vector<8x128xf32>
      %90 = vector.broadcast %cst_40 : f32 to vector<8x128xf32>
      %91 = arith.select %88, %89, %90 : vector<8x128xi1>, vector<8x128xf32>
      %92 = vector.broadcast %71 : f32 to vector<8x128xf32>
      %93 = arith.select %83, %92, %91 : vector<8x128xi1>, vector<8x128xf32>
      %c0_41 = arith.constant 0 : index
      %c0_42 = arith.constant 0 : index
      %94 = vector.load %arg5[%c0_41, %c0_42] : memref<8x128xf32, #tpu.memory_space<vmem>>, vector<8x128xf32>
      tpu.vector_store %arg5[%c0_41, %c0_42], %93 {strides = array<i32>} : memref<8x128xf32, #tpu.memory_space<vmem>>, vector<8x128xf32>,
    } else {
    }
    return
  }
  func.func @transform_0(%arg0: i32, %arg1: i32) -> (i32, i32) {
    %c1_i32 = arith.constant 1 : i32
    %0 = arith.muli %arg0, %c1_i32 : i32
    %1 = arith.addi %0, %arg1 : i32
    %c0_i32 = arith.constant 0 : i32
    %2 = arith.minsi %1, %c0_i32 : i32
    %c0_i32_0 = arith.constant 0 : i32
    %c0_i32_1 = arith.constant 0 : i32
    return %2, %c0_i32_0 : i32, i32
  }
  func.func @transform_1(%arg0: i32, %arg1: i32) -> (i32, i32) {
    %c1_i32 = arith.constant 1 : i32
    %0 = arith.muli %arg0, %c1_i32 : i32
    %1 = arith.addi %0, %arg1 : i32
    %c0_i32 = arith.constant 0 : i32
    %2 = arith.minsi %1, %c0_i32 : i32
    %c0_i32_0 = arith.constant 0 : i32
    %c0_i32_1 = arith.constant 0 : i32
    return %2, %c0_i32_0 : i32, i32
  }
  func.func @transform_2(%arg0: i32, %arg1: i32) -> (i32, i32) {
    %c0_i32 = arith.constant 0 : i32
    %c0_i32_0 = arith.constant 0 : i32
    %c0_i32_1 = arith.constant 0 : i32
    return %c0_i32, %c0_i32_0 : i32, i32
  }
  func.func @transform_3(%arg0: i32, %arg1: i32) -> (i32, i32) {
    %c0_i32 = arith.constant 0 : i32
    %c0_i32_0 = arith.constant 0 : i32
    return %arg0, %c0_i32 : i32, i32
  }
}

</mosaic_0001>

<bundles_post_ra>
// kernel: tpu_custom_call.1
= control target key start
LH: loop header
LB: loop body
LE: loop exit
PB: predicated region body
PF: predicated region fallthrough
CT: control target
= control target key end

     0   :  { %vm103_vm0 = vcmask 80896   ;;  %v318_v4 = vmov 0   ;;  %s397_s0 = inlined_call_operand.vmem [shape: f32[16,10], index: 0, kind: input, shape index: {}]   ;;  %s398_s1 = inlined_call_operand.vmem [shape: s32[16,1], index: 1, kind: input, shape index: {}]   ;;  %s399_s2 = inlined_call_operand.vmem [shape: f32[1,10], index: 2, kind: input, shape index: {}]   ;;  %s400_s3 = inlined_call_operand.hbm [shape: f32[8,128], index: 3, kind: output, shape index: {}]  }
   0x1   :  { %v88_v0 = vld [vmem:[%s397_s0] sm:$0xff]  ;;  %v89_v1 = vld [vmem:[%s397_s0 + $0x8] sm:$0xff]  ;;  %282 = vset.pattern.permute.xlu1 %v318_v4  ;;  %283 = vset.pattern.permute.xlu0 %v318_v4 }
   0x2   :  { %v90_v2 = vld [vmem:[%s398_s1] sm:$0xff]  ;;  %v104_v3 = vsel %vm103_vm0, %v88_v0, -inf }
   0x3   :  { %8 = vsyncpa [#allocation5], 0  ;;  %105 = vmax.xlane.f32.xlu0 %v104_v3  ;;  %96 = vperm.xlu1 %282, %v90_v2   ;;  %v107_v5 = vsel %vm103_vm0, %v89_v1, -inf  ;;  %v91_v6 = vld [vmem:[%s398_s1 + $0x8] sm:$0xff]  ;;  %v93_v13 = vlaneseq  ;;  %v274_v26 = vld [vmem:[%s399_s2] ss:$0 sm:$0xff] }
   0x4   :  { %vm83_vm3 = vcmask 7168   ;;  %v319_v31 = vmov 0.0   ;;  %s320_s20 = smov [#allocation4]  }
   0x5   :  { %v356_v15 = vand.u32 127, %v93_v13  ;;  %84 = vst.msk [vmem:[#allocation2] sm:$0xff] %vm83_vm3, %v319_v31  ;;  %86 = vst.msk [vmem:[#allocation3] sm:$0xff] %vm83_vm3, %v319_v31  ;;  %s254_s21 = sshll.u32 %s320_s20, 4  ;;  %s255_s21 = int_to_ptr.vmem [resolvable:$true] %s254_s21 }
   0x6   :  { %85 = vst.msk [vmem:[#allocation2 + $0x8] sm:$0xff] %vm83_vm3, %v319_v31  ;;  %87 = vst.msk [vmem:[#allocation3 + $0x8] sm:$0xff] %vm83_vm3, %v319_v31  ;;  %s296_s23 = scalar_lea.vmem %s255_s21, 128  ;;  %p301_p1 = scmp.lt.s32.totalorder %s255_s21, %s255_s21 }
   0x7   :  { %108 = vmax.xlane.f32.xlu0 %v107_v5  ;;  %99 = vperm.xlu1 %282, %v91_v6   ;;  %vm241_vm5 = vcmp.eq.s32.totalorder %v356_v15, 1  ;;  %vm239_vm6 = vcmp.eq.s32.totalorder %v356_v15, 0  ;;  %p297_p0 = scmp.ne.s32.totalorder %s255_s21, %s296_s23  ;;  %p302_p2 = scmp.lt.s32.totalorder %s296_s23, %s296_s23 }
   0x9   :  { %p303_p3 = por %p302_p2, %p301_p1 }
   0xb   :  { %p304_p4 = pnand %p303_p3, %p297_p0 }
   0xc   :  { %v199_v45 = vld [vmem:[#allocation3] sm:$0xff]  ;;  %v188_v6 = vld [vmem:[#allocation2] sm:$0xff] }
   0xd   :  { %v200_v50 = vld [vmem:[#allocation3 + $0x8] sm:$0xff] }
  0x7e   :  { %v97_v14 = vpop.permute.xlu1 %96 }
  0x7f   :  { %vm101_vm1 = vcmp.eq.s32.totalorder %v356_v15, %v97_v14 }
  0x80   :  { %v170_v28 = vsel %vm101_vm1, %v274_v26, 0.0 }
  0x81   :  { %v172_v29 = vsel %vm103_vm0, %v170_v28, 0.0 }
  0x82   :  { %v100_v17 = vpop.permute.xlu1 %99 }
  0x83   :  { %vm102_vm2 = vcmp.eq.s32.totalorder %v356_v15, %v100_v17 }
  0x84   :  { %v171_v30 = vsel %vm102_vm2, %v274_v26, 0.0 }
  0x85   :  { %v175_v32 = vsel %vm103_vm0, %v171_v30, 0.0 }
  0x8c   :  { %v106_v7 = vpop.xlane.xlu0 %105 }
  0x8d   :  { %v110_v8 = vsub.f32 %v88_v0, %v106_v7 }
  0x8f   :  { %v112_v9 = vmul.f32 1.442695, %v110_v8  ;;  %v132_v19 = vsel %vm101_vm1, %v110_v8, 0.0  ;;  %v126_v25 = vsel %vm103_vm0, %v110_v8, 0.0 }
  0x90   :  { %v109_v10 = vpop.xlane.xlu0 %108  ;;  %v134_v21 = vsel %vm103_vm0, %v132_v19, 0.0 }
  0x91   :  { %284 = vpow2.f32 %v112_v9  ;;  %v111_v11 = vsub.f32 %v89_v1, %v109_v10 }
  0x93   :  { %v114_v12 = vmul.f32 1.442695, %v111_v11  ;;  %v133_v23 = vsel %vm102_vm2, %v111_v11, 0.0  ;;  %v129_v27 = vsel %vm103_vm0, %v111_v11, 0.0 }
  0x94   :  { %v137_v24 = vsel %vm103_vm0, %v133_v23, 0.0 }
  0x95   :  { %286 = vpow2.f32 %v114_v12  ;;  %v189_v12 = vld [vmem:[#allocation2 + $0x8] sm:$0xff] }
  0x9e   :  { %v285_v16 = vpop.eup %284 }
  0x9f   :  { %v116_v18 = vsel %vm103_vm0, %v285_v16, 0.0 }
  0xa0   :  { %117 = vadd.xlane.f32.xlu0 %v116_v18 }
  0xa2   :  { %v287_v20 = vpop.eup %286 }
  0xa3   :  { %v119_v22 = vsel %vm103_vm0, %v287_v20, 0.0 }
  0xa4   :  { %135 = vadd.xlane.f32.xlu0 %v134_v21  ;;  %120 = vadd.xlane.f32.xlu1 %v119_v22 }
  0xa8   :  { %138 = vadd.xlane.f32.xlu0 %v137_v24 }
  0xac   :  { %127 = vadd.xlane.f32.xlu0 %v126_v25 }
  0xb0   :  { %130 = vadd.xlane.f32.xlu0 %v129_v27 }
  0xb4   :  { %173 = vadd.xlane.f32.xlu0 %v172_v29 }
  0xb8   :  { %176 = vadd.xlane.f32.xlu0 %v175_v32 }
 0x129   :  { %v118_v33 = vpop.xlane.xlu0 %117 }
 0x12a   :  { %288 = vlog2.f32 %v118_v33 }
 0x12d   :  { %v121_v34 = vpop.xlane.xlu1 %120  ;;  %v136_v35 = vpop.xlane.xlu0 %135 }
 0x12e   :  { %290 = vlog2.f32 %v121_v34 }
 0x131   :  { %v139_v36 = vpop.xlane.xlu0 %138 }
 0x135   :  { %v128_v37 = vpop.xlane.xlu0 %127 }
 0x137   :  { %v289_v38 = vpop.eup %288 }
 0x138   :  { %v123_v39 = vmul.f32 0.6931472, %v289_v38 }
 0x139   :  { %v131_v40 = vpop.xlane.xlu0 %130 }
 0x13a   :  { %v144_v41 = vsub.f32 %v136_v35, %v123_v39  ;;  %v140_v48 = vmul.f32 10.0, %v123_v39 }
 0x13b   :  { %v291_v42 = vpop.eup %290 }
 0x13c   :  { %v154_v43 = vmul.f32 1.442695, %v144_v41  ;;  %v125_v44 = vmul.f32 0.6931472, %v291_v42  ;;  %v142_v53 = vsub.f32 %v128_v37, %v140_v48  ;;  %v148_v58 = vmul.f32 0.8888889, %v144_v41 }
 0x13d   :  { %v174_v46 = vpop.xlane.xlu0 %173  ;;  %v179_v41 = vshrl.u32 %v93_v13, 7 }
 0x13e   :  { %292 = vpow2.f32 %v154_v43  ;;  %v145_v47 = vsub.f32 %v139_v36, %v125_v44  ;;  %v203_v49 = vadd.f32 %v199_v45, %v174_v46  ;;  %v141_v54 = vmul.f32 10.0, %v125_v44 }
 0x13f   :  { %v146_v56 = vmul.f32 0.011111111, %v142_v53  ;;  %vm238_vm4 = vcmp.eq.s32.totalorder %v179_v41, 0 }
 0x140   :  { %v156_v51 = vmul.f32 1.442695, %v145_v47  ;;  %205 = vst.msk [vmem:[#allocation3] sm:$0xff] %vm83_vm3, %v203_v49  ;;  %v143_v57 = vsub.f32 %v131_v40, %v141_v54  ;;  %v149_v62 = vmul.f32 0.8888889, %v145_v47  ;;  %vm242_vm7 = vmand %vm238_vm4, %vm241_vm5 }
 0x141   :  { %v177_v52 = vpop.xlane.xlu0 %176  ;;  %v150_v59 = vadd.f32 %v148_v58, %v146_v56  ;;  %vm240_vm8 = vmand %vm238_vm4, %vm239_vm6 }
 0x142   :  { %294 = vpow2.f32 %v156_v51  ;;  %v204_v55 = vadd.f32 %v200_v50, %v177_v52  ;;  %v147_v60 = vmul.f32 0.011111111, %v143_v57 }
 0x143   :  { %v152_v0 = vsub.f32 0.0, %v150_v59 }
 0x144   :  { %206 = vst.msk [vmem:[#allocation3 + $0x8] sm:$0xff] %vm83_vm3, %v204_v55  ;;  %v151_v1 = vadd.f32 %v149_v62, %v147_v60 }
 0x146   :  { %v153_v7 = vsub.f32 0.0, %v151_v1 }
 0x147   :  { %v224_v23 = vld [vmem:[#allocation3] sm:$0xff] }
 0x148   :  { %v226_v25 = vsel %vm83_vm3, %v224_v23, 0.0 }
 0x14b   :  { %v293_v61 = vpop.eup %292  ;;  %v225_v19 = vld [vmem:[#allocation3 + $0x8] sm:$0xff] }
 0x14c   :  { %v158_v63 = vsub.f32 1.0, %v293_v61  ;;  %v227_v24 = vsel %vm83_vm3, %v225_v19, 0.0 }
 0x14d   :  { %v228_v26 = vadd.f32 %v227_v24, %v226_v25 }
 0x14e   :  { %v160_v2 = vmul.f32 %v158_v63, %v158_v63 }
 0x14f   :  { %v295_v3 = vpop.eup %294 }
 0x150   :  { %v162_v4 = vmul.f32 %v160_v2, %v152_v0  ;;  %v159_v5 = vsub.f32 1.0, %v295_v3 }
 0x152   :  { %v190_v8 = vmul.f32 %v174_v46, %v162_v4  ;;  %v161_v9 = vmul.f32 %v159_v5, %v159_v5 }
 0x154   :  { %v194_v10 = vadd.f32 %v190_v8, %v188_v6  ;;  %v163_v11 = vmul.f32 %v161_v9, %v153_v7 }
 0x156   :  { %197 = vst.msk [vmem:[#allocation2] sm:$0xff] %vm83_vm3, %v194_v10  ;;  %v191_v14 = vmul.f32 %v177_v52, %v163_v11 }
 0x158   :  { %v195_v16 = vadd.f32 %v191_v14, %v189_v12 }
 0x15a   :  { %198 = vst.msk [vmem:[#allocation2 + $0x8] sm:$0xff] %vm83_vm3, %v195_v16 }
 0x15d   :  { %v210_v17 = vld [vmem:[#allocation2] sm:$0xff] }
 0x15e   :  { %v212_v20 = vsel %vm83_vm3, %v210_v17, 0.0 }
 0x161   :  { %v211_v18 = vld [vmem:[#allocation2 + $0x8] sm:$0xff] }
 0x162   :  { %v213_v21 = vsel %vm83_vm3, %v211_v18, 0.0 }
 0x163   :  { %v214_v22 = vadd.f32 %v213_v21, %v212_v20 }
 0x165   :  { %215 = vadd.xlane.f32.xlu0 %v214_v22 }
 0x169   :  { %229 = vadd.xlane.f32.xlu0 %v228_v26 }
 0x1ee   :  { %v216_v27 = vpop.xlane.xlu0 %215 }
 0x1ef   :  { %v217_v28 = vrot.slane %v216_v27, 4 }
 0x1f1   :  { %v218_v29 = vadd.f32 %v217_v28, %v216_v27 }
 0x1f2   :  { %v230_v30 = vpop.xlane.xlu0 %229 }
 0x1f3   :  { %v219_v31 = vrot.slane %v218_v29, 2  ;;  %v231_v32 = vrot.slane %v230_v30, 4 }
 0x1f5   :  { %v232_v33 = vadd.f32 %v231_v32, %v230_v30  ;;  %v220_v34 = vadd.f32 %v219_v31, %v218_v29 }
 0x1f7   :  { %v233_v35 = vrot.slane %v232_v33, 2  ;;  %v221_v36 = vrot.slane %v220_v34, 1 }
 0x1f9   :  { %v234_v37 = vadd.f32 %v233_v35, %v232_v33  ;;  %v222_v38 = vadd.f32 %v221_v36, %v220_v34 }
 0x1fb   :  { %275 = vpush %v222_v38  ;;  %v235_v39 = vrot.slane %v234_v37, 1 }
 0x1fd   :  { %v236_v40 = vadd.f32 %v235_v39, %v234_v37 }
 0x1ff   :  { %277 = vpush %v236_v40 }
 0x22c   :  { %s276_s2 = spop %275 }
 0x22d   :  { %v245_v43 = vstv %s276_s2 }
 0x230   :  { %s278_s22 = spop %277 }
 0x231   :  { %v243_v42 = vstv %s278_s22 }
 0x232   :  { %v244_v44 = vsel %vm242_vm7, %v243_v42, 0.0 }
 0x233   :  { %v246_v45 = vsel %vm240_vm8, %v245_v43, %v244_v44 }
 0x234   :  { %247 = vst [vmem:[#allocation4] sm:$0xff] %v246_v45 }
 0x235   :  { %307 = shalt.err (!%p304_p4)
}
 0x236   :  { %257 = dma.vmem_to_hbm [thread:$0]  %s255_s21, 128, %s400_s3, [#allocation5]  }
 0x237   :  { %316 = dma.done.wait [#allocation5], 128  }
 0x238   :  { %317 = vsyncadd [#allocation5], 4294967168 }
 0x239   :  { %261 = vsyncpa [#allocation5], 1 }

</bundles_post_ra>
